<compile_context>
chip_gen: v6e
topology: v6e:2x2x1
jax: 0.10.0
libtpu: 0.0.40
codegen_flags: <defaults>
</compile_context>

<pallas_src>
import jax
import jax.numpy as jnp
from jax.experimental import pallas as pl
from jax.experimental.pallas import tpu as pltpu


def _round_up(x, m):
    return ((x + m - 1) // m) * m


def mlp_kernel(x_ref, w1_ref, b1_ref, w2_ref, b2_ref, o_ref):
    # First linear: (TB, F) @ (F, Hp) + (1, Hp), f32 accumulation on the MXU.
    h = jnp.dot(x_ref[...], w1_ref[...], preferred_element_type=jnp.float32)
    h = jnp.maximum(h + b1_ref[...], 0.0)  # bias broadcast + ReLU (VPU)
    # Second linear: (TB, Hp) @ (Hp, Ap) + (1, Ap)
    y = jnp.dot(h.astype(w2_ref.dtype), w2_ref[...],
                preferred_element_type=jnp.float32)
    o_ref[...] = (y + b2_ref[...]).astype(o_ref.dtype)


def neural_network_forward(x, w1, b1, w2, b2, *, block_b=512,
                           compute_dtype=jnp.float32):
    """Forward pass of NeuralNetwork.

    x:  (B, F) f32
    w1: (F, H) f32   b1: (1, H) f32
    w2: (H, A) f32   b2: (1, A) f32
    Returns (B, A) f32.

    compute_dtype=jnp.bfloat16 halves x/weight HBM traffic on v6e/v7x while
    keeping f32 accumulation (biases and output stay f32).
    """
    B, F = x.shape
    H = w1.shape[1]
    A = w2.shape[1]

    # ---- lane-pad hidden / action dims to multiples of 128 --------------------
    H_pad = _round_up(max(H, 128), 128)
    A_pad = _round_up(max(A, 128), 128)

    w1_p = jnp.zeros((F, H_pad), jnp.float32).at[:, :H].set(w1)
    b1_p = jnp.zeros((1, H_pad), jnp.float32).at[:, :H].set(b1)
    # zero rows for padded hidden units, zero cols for padded actions
    w2_p = jnp.zeros((H_pad, A_pad), jnp.float32).at[:H, :A].set(w2)
    b2_p = jnp.zeros((1, A_pad), jnp.float32).at[:, :A].set(b2)

    # ---- optional reduced-precision MXU operands ------------------------------
    x_c = x.astype(compute_dtype)
    w1_c = w1_p.astype(compute_dtype)
    w2_c = w2_p.astype(compute_dtype)

    # ---- tile the batch axis ---------------------------------------------------
    # TB large enough to amortize ~0.35 us/step overhead, but never larger than
    # the (8-aligned) batch so tiny demo batches don't compute on padding.
    TB = min(block_b, _round_up(B, 8))
    B_pad = _round_up(B, TB)
    if B_pad != B:
        x_c = jnp.zeros((B_pad, F), compute_dtype).at[:B, :].set(x_c)
    grid = (B_pad // TB,)

    cost = pl.CostEstimate(
        flops=2 * B_pad * (F * H_pad + H_pad * A_pad),
        bytes_accessed=(x_c.dtype.itemsize * B_pad * F
                        + w1_c.dtype.itemsize * F * H_pad
                        + w2_c.dtype.itemsize * H_pad * A_pad
                        + 4 * (H_pad + A_pad)
                        + 4 * B_pad * A_pad),
        transcendentals=0,
    )

    out = pl.pallas_call(
        mlp_kernel,
        out_shape=jax.ShapeDtypeStruct((B_pad, A_pad), jnp.float32),
        grid_spec=pltpu.PrefetchScalarGridSpec(
            num_scalar_prefetch=0,
            grid=grid,
            in_specs=[
                # streamed per batch-tile
                pl.BlockSpec((TB, F), lambda i: (i, 0)),
                # weights/biases: constant block index -> resident across steps
                pl.BlockSpec((F, H_pad), lambda i: (0, 0)),
                pl.BlockSpec((1, H_pad), lambda i: (0, 0)),
                pl.BlockSpec((H_pad, A_pad), lambda i: (0, 0)),
                pl.BlockSpec((1, A_pad), lambda i: (0, 0)),
            ],
            out_specs=pl.BlockSpec((TB, A_pad), lambda i: (i, 0)),
        ),
        compiler_params=pltpu.CompilerParams(
            # batch tiles are independent -> megacore sharding on v7x
            dimension_semantics=("parallel",),
        ),
        cost_estimate=cost,
    )(x_c, w1_c, b1_p, w2_c, b2_p)

    # slice off batch + lane padding outside the kernel
    return out[:B, :A]


def init_params(key, feature_size, action_size, hidden_size=50):
    """Xavier-uniform weights, biases filled with 0.01 (mirrors init_weights)."""
    k1, k2 = jax.random.split(key)

    def xavier_uniform(k, fan_in, fan_out):
        limit = jnp.sqrt(6.0 / (fan_in + fan_out))
        # stored as (in_features, out_features) so kernel does x @ W
        return jax.random.uniform(
            k, (fan_in, fan_out), dtype=jnp.float32, minval=-limit, maxval=limit
        )

    w1 = xavier_uniform(k1, feature_size, hidden_size)
    b1 = jnp.full((1, hidden_size), 0.01, dtype=jnp.float32)
    w2 = xavier_uniform(k2, hidden_size, action_size)
    b2 = jnp.full((1, action_size), 0.01, dtype=jnp.float32)
    return w1, b1, w2, b2


if __name__ == "__main__":
    feature_size = 32
    action_size = 8
    hidden_size = 50
    batch = 8

    key = jax.random.PRNGKey(0)
    kx, kp = jax.random.split(key)

    x = jax.random.normal(kx, (batch, feature_size), dtype=jnp.float32)
    w1, b1, w2, b2 = init_params(kp, feature_size, action_size, hidden_size)

    out = neural_network_forward(x, w1, b1, w2, b2)
    out = jax.block_until_ready(out)

    # Pure-JAX reference check
    ref = jnp.maximum(x @ w1 + b1, 0.0) @ w2 + b2
    assert out.shape == (batch, action_size)
    assert jnp.allclose(out, ref, atol=1e-5, rtol=1e-5)

    # Also exercise a batch that needs tiling + padding of the batch axis.
    big_batch = 1000
    xb = jax.random.normal(kx, (big_batch, feature_size), dtype=jnp.float32)
    out_b = jax.block_until_ready(
        neural_network_forward(xb, w1, b1, w2, b2, block_b=512))
    ref_b = jnp.maximum(xb @ w1 + b1, 0.0) @ w2 + b2
    assert out_b.shape == (big_batch, action_size)
    assert jnp.allclose(out_b, ref_b, atol=1e-4, rtol=1e-4)

    print("KERNEL_OK")
</pallas_src>

<mosaic_0001>
module attributes {stable_mosaic.version = 11 : i64} {
  func.func @mlp_kernel(%arg0: i32, %arg1: memref<8x32xf32, #tpu.memory_space<vmem>>, %arg2: memref<32x128xf32, #tpu.memory_space<vmem>>, %arg3: memref<1x128xf32, #tpu.memory_space<vmem>>, %arg4: memref<128x128xf32, #tpu.memory_space<vmem>>, %arg5: memref<1x128xf32, #tpu.memory_space<vmem>>, %arg6: memref<8x128xf32, #tpu.memory_space<vmem>>) attributes {dimension_semantics = [#tpu.dimension_semantics<parallel>], iteration_bounds = array<i64: 1>, scalar_prefetch = 0 : i64, scratch_operands = 0 : i64, tpu.core_type = #tpu.core_type<tc>, window_params = [{transform_indices = @transform_0, window_bounds = array<i64: 8, 32>}, {pipeline_mode = #tpu.pipeline_mode<synchronous>, transform_indices = @transform_1, window_bounds = array<i64: 32, 128>}, {pipeline_mode = #tpu.pipeline_mode<synchronous>, transform_indices = @transform_2, window_bounds = array<i64: 1, 128>}, {pipeline_mode = #tpu.pipeline_mode<synchronous>, transform_indices = @transform_3, window_bounds = array<i64: 128, 128>}, {pipeline_mode = #tpu.pipeline_mode<synchronous>, transform_indices = @transform_4, window_bounds = array<i64: 1, 128>}, {transform_indices = @transform_5, window_bounds = array<i64: 8, 128>}]} {
    %c0 = arith.constant 0 : index
    %c0_0 = arith.constant 0 : index
    %0 = vector.load %arg1[%c0, %c0_0] : memref<8x32xf32, #tpu.memory_space<vmem>>, vector<8x32xf32>
    %c0_1 = arith.constant 0 : index
    %c0_2 = arith.constant 0 : index
    %1 = vector.load %arg2[%c0_1, %c0_2] : memref<32x128xf32, #tpu.memory_space<vmem>>, vector<32x128xf32>
    %cst = arith.constant dense<0.000000e+00> : vector<8x128xf32>
    %2 = tpu.matmul %0, %1, %cst {dimension_numbers = #tpu.dot_dimension_numbers<[1], [0], [0], [1], [0, 0, 1, 1], [], []>} : vector<8x32xf32>, vector<32x128xf32>, vector<8x128xf32> -> vector<8x128xf32>
    %c0_3 = arith.constant 0 : index
    %c0_4 = arith.constant 0 : index
    %3 = vector.load %arg3[%c0_3, %c0_4] : memref<1x128xf32, #tpu.memory_space<vmem>>, vector<1x128xf32>
    %4 = vector.broadcast %3 : vector<1x128xf32> to vector<8x128xf32>
    %5 = arith.addf %2, %4 : vector<8x128xf32>
    %cst_5 = arith.constant 0.000000e+00 : f32
    %6 = vector.broadcast %cst_5 : f32 to vector<8x128xf32>
    %7 = arith.maximumf %5, %6 : vector<8x128xf32>
    %c0_6 = arith.constant 0 : index
    %c0_7 = arith.constant 0 : index
    %8 = vector.load %arg4[%c0_6, %c0_7] : memref<128x128xf32, #tpu.memory_space<vmem>>, vector<128x128xf32>
    %cst_8 = arith.constant dense<0.000000e+00> : vector<8x128xf32>
    %9 = tpu.matmul %7, %8, %cst_8 {dimension_numbers = #tpu.dot_dimension_numbers<[1], [0], [0], [1], [0, 0, 1, 1], [], []>} : vector<8x128xf32>, vector<128x128xf32>, vector<8x128xf32> -> vector<8x128xf32>
    %c0_9 = arith.constant 0 : index
    %c0_10 = arith.constant 0 : index
    %10 = vector.load %arg5[%c0_9, %c0_10] : memref<1x128xf32, #tpu.memory_space<vmem>>, vector<1x128xf32>
    %11 = vector.broadcast %10 : vector<1x128xf32> to vector<8x128xf32>
    %12 = arith.addf %9, %11 : vector<8x128xf32>
    %c0_11 = arith.constant 0 : index
    %c0_12 = arith.constant 0 : index
    %13 = vector.load %arg6[%c0_11, %c0_12] : memref<8x128xf32, #tpu.memory_space<vmem>>, vector<8x128xf32>
    tpu.vector_store %arg6[%c0_11, %c0_12], %12 {strides = array<i32>} : memref<8x128xf32, #tpu.memory_space<vmem>>, vector<8x128xf32>,
    return
  }
  func.func @transform_0(%arg0: i32) -> (i32, i32) {
    %c0_i32 = arith.constant 0 : i32
    %c0_i32_0 = arith.constant 0 : i32
    return %arg0, %c0_i32 : i32, i32
  }
  func.func @transform_1(%arg0: i32) -> (i32, i32) {
    %c0_i32 = arith.constant 0 : i32
    %c0_i32_0 = arith.constant 0 : i32
    %c0_i32_1 = arith.constant 0 : i32
    return %c0_i32, %c0_i32_0 : i32, i32
  }
  func.func @transform_2(%arg0: i32) -> (i32, i32) {
    %c0_i32 = arith.constant 0 : i32
    %c0_i32_0 = arith.constant 0 : i32
    %c0_i32_1 = arith.constant 0 : i32
    return %c0_i32, %c0_i32_0 : i32, i32
  }
  func.func @transform_3(%arg0: i32) -> (i32, i32) {
    %c0_i32 = arith.constant 0 : i32
    %c0_i32_0 = arith.constant 0 : i32
    %c0_i32_1 = arith.constant 0 : i32
    return %c0_i32, %c0_i32_0 : i32, i32
  }
  func.func @transform_4(%arg0: i32) -> (i32, i32) {
    %c0_i32 = arith.constant 0 : i32
    %c0_i32_0 = arith.constant 0 : i32
    %c0_i32_1 = arith.constant 0 : i32
    return %c0_i32, %c0_i32_0 : i32, i32
  }
  func.func @transform_5(%arg0: i32) -> (i32, i32) {
    %c0_i32 = arith.constant 0 : i32
    %c0_i32_0 = arith.constant 0 : i32
    return %arg0, %c0_i32 : i32, i32
  }
}

</mosaic_0001>

<bundles_post_ra>
// kernel: tpu_custom_call.1
= control target key start
LH: loop header
LB: loop body
LE: loop exit
PB: predicated region body
PF: predicated region fallthrough
CT: control target
= control target key end

     0   :  { %10 = vsyncpa [#allocation3], 0  ;;  %s500_s0 = inlined_call_operand.hbm [shape: f32[8,32], index: 0, kind: input, shape index: {}]   ;;  %s501_s1 = inlined_call_operand.hbm [shape: f32[32,128], index: 1, kind: input, shape index: {}]   ;;  %s502_s2 = inlined_call_operand.vmem [shape: f32[1,128], index: 2, kind: input, shape index: {}]   ;;  %s503_s3 = inlined_call_operand.hbm [shape: f32[128,128], index: 3, kind: input, shape index: {}]   ;;  %s504_s4 = inlined_call_operand.vmem [shape: f32[1,128], index: 4, kind: input, shape index: {}]   ;;  %s505_s5 = inlined_call_operand.hbm [shape: f32[8,128], index: 5, kind: output, shape index: {}]  }
   0x1   :  { %11 = vsyncpa [#allocation6], 0 }
   0x2   :  { %12 = vsyncpa [#allocation4], 0  ;;  %s422_s18 = smov [#allocation5]  }
   0x3   :  { %s28_s19 = sshll.u32 %s422_s18, 4  ;;  %s29_s19 = int_to_ptr.vmem [resolvable:$true] %s28_s19 }
   0x4   :  { %s344_s20 = scalar_lea.vmem %s29_s19, 512  ;;  %p349_p1 = scmp.lt.s32.totalorder %s29_s19, %s29_s19 }
   0x5   :  { %p345_p0 = scmp.ne.s32.totalorder %s29_s19, %s344_s20  ;;  %p350_p2 = scmp.lt.s32.totalorder %s344_s20, %s344_s20 }
   0x7   :  { %p351_p3 = por %p350_p2, %p349_p1 }
   0x9   :  { %p352_p4 = pnand %p351_p3, %p345_p0 }
   0xb   :  { %355 = shalt.err (!%p352_p4)
}
   0xc   :  { %s423_s21 = smov 128   ;;  %s424_s22 = smov 8  }
   0xd   :  { %34 = dma.hbm_to_vmem [thread:$0]  %s501_s1, 512, %s29_s19, [#allocation6], %s423_s21, %s423_s21, %s424_s22  }
   0xe   :  { %s425_s25 = smov [#allocation2]   ;;  %s426_s27 = smov [#allocation7]  }
   0xf   :  { %s19_s26 = sshll.u32 %s425_s25, 4  ;;  %s42_s28 = sshll.u32 %s426_s27, 4  ;;  %s20_s26 = int_to_ptr.vmem [resolvable:$true] %s19_s26  ;;  %s43_s28 = int_to_ptr.vmem [resolvable:$true] %s42_s28 }
  0x10   :  { %s364_s29 = scalar_lea.vmem %s20_s26, 128  ;;  %p369_p6 = scmp.lt.s32.totalorder %s20_s26, %s20_s26 }
  0x11   :  { %p365_p5 = scmp.ne.s32.totalorder %s20_s26, %s364_s29  ;;  %p370_p7 = scmp.lt.s32.totalorder %s364_s29, %s364_s29 }
  0x13   :  { %p371_p8 = por %p370_p7, %p369_p6 }
  0x15   :  { %p372_p9 = pnand %p371_p8, %p365_p5 }
  0x17   :  { %375 = shalt.err (!%p372_p9)
}
  0x18   :  { %22 = dma.hbm_to_vmem [thread:$0]  %s500_s0, 128, %s20_s26, [#allocation3]  }
  0x19   :  { %s384_s7 = scalar_lea.vmem %s43_s28, 2048  ;;  %p389_p11 = scmp.lt.s32.totalorder %s43_s28, %s43_s28 }
  0x1a   :  { %p385_p10 = scmp.ne.s32.totalorder %s43_s28, %s384_s7  ;;  %p390_p12 = scmp.lt.s32.totalorder %s384_s7, %s384_s7 }
  0x1c   :  { %p391_p13 = por %p390_p12, %p389_p11 }
  0x1e   :  { %p392_p0 = pnand %p391_p13, %p385_p10 }
  0x20   :  { %395 = shalt.err (!%p392_p0)
}
  0x21   :  { %48 = dma.hbm_to_vmem [thread:$0]  %s503_s3, 2048, %s43_s28, [#allocation6], %s423_s21, %s423_s21, %s424_s22  }
  0x22   :  { %416 = dma.done.wait [#allocation3], 128  }
  0x23   :  { %417 = vsyncadd [#allocation3], 4294967168 }
  0x24   :  { %418 = dma.done.wait [#allocation6], 2560  }
  0x25   :  { %419 = vsyncadd [#allocation6], 4294964736  ;;  %v427_v0 = vmov 0.0   ;;  %vm428_vm0 = vmmov 0   ;;  %v64_v1 = vld [vmem:[#allocation5 + $0x18] sm:$0xff]  ;;  %v63_v2 = vld [vmem:[#allocation5 + $0x10] sm:$0xff] }
  0x26   :  { %282 = vmatprep.subr.mxu0 %v427_v0  ;;  %290 = vmatprep.mubr.msk.f32.mxu0 %vm428_vm0, %v427_v0  ;;  %v162_v3 = vld [vmem:[#allocation7 + $0x78] sm:$0xff]  ;;  %v62_v4 = vld [vmem:[#allocation5 + $0x8] sm:$0xff]  ;;  %v161_v5 = vld [vmem:[#allocation7 + $0x70] sm:$0xff]  ;;  %vm72_vm1 = vcmask 261120   ;;  %s429_s11 = smov [#allocation8]  }
  0x27   :  { %293 = vmatprep.subr.mxu1 %v427_v0  ;;  %325 = vmatprep.mubr.msk.f32.mxu1 %vm428_vm0, %v427_v0  ;;  %v160_v6 = vld [vmem:[#allocation7 + $0x68] sm:$0xff]  ;;  %v61_v7 = vld [vmem:[#allocation5] sm:$0xff]  ;;  %v60_v8 = vld [vmem:[#allocation2] sm:$0xff]  ;;  %s247_s12 = sshll.u32 %s429_s11, 4  ;;  %s248_s12 = int_to_ptr.vmem [resolvable:$true] %s247_s12 }
  0x28   :  { %283 = vmatpush3.msra.mxu0 %v64_v1  ;;  %294 = vmatpush3.msra.mxu1 %v162_v3  ;;  %v159_v9 = vld [vmem:[#allocation7 + $0x60] sm:$0xff]  ;;  %v158_v10 = vld [vmem:[#allocation7 + $0x58] sm:$0xff]  ;;  %v157_v11 = vld [vmem:[#allocation7 + $0x50] sm:$0xff]  ;;  %s396_s13 = scalar_lea.vmem %s248_s12, 128  ;;  %p401_p2 = scmp.lt.s32.totalorder %s248_s12, %s248_s12 }
  0x29   :  { %284 = vmatprep.subr.mxu0 %v427_v0  ;;  %295 = vmatprep.subr.mxu1 %v427_v0  ;;  %v156_v12 = vld [vmem:[#allocation7 + $0x48] sm:$0xff]  ;;  %v155_v13 = vld [vmem:[#allocation7 + $0x40] sm:$0xff]  ;;  %v154_v14 = vld [vmem:[#allocation7 + $0x38] sm:$0xff]  ;;  %p397_p1 = scmp.ne.s32.totalorder %s248_s12, %s396_s13  ;;  %p402_p3 = scmp.lt.s32.totalorder %s396_s13, %s396_s13 }
  0x2a   :  { %285 = vmatpush3.msra.mxu0 %v63_v2  ;;  %296 = vmatpush3.msra.mxu1 %v161_v5  ;;  %v153_v15 = vld [vmem:[#allocation7 + $0x30] sm:$0xff]  ;;  %v152_v16 = vld [vmem:[#allocation7 + $0x28] sm:$0xff]  ;;  %v151_v17 = vld [vmem:[#allocation7 + $0x20] sm:$0xff] }
  0x2b   :  { %286 = vmatprep.subr.mxu0 %v427_v0  ;;  %297 = vmatprep.subr.mxu1 %v427_v0  ;;  %v150_v18 = vld [vmem:[#allocation7 + $0x18] sm:$0xff]  ;;  %v149_v19 = vld [vmem:[#allocation7 + $0x10] sm:$0xff]  ;;  %v148_v20 = vld [vmem:[#allocation7 + $0x8] sm:$0xff]  ;;  %p403_p4 = por %p402_p3, %p401_p2 }
  0x2c   :  { %287 = vmatpush3.msra.mxu0 %v62_v4  ;;  %298 = vmatpush3.msra.mxu1 %v160_v6  ;;  %v147_v21 = vld [vmem:[#allocation7] sm:$0xff]  ;;  %v257_v22 = vld [vmem:[%s502_s2] ss:$0 sm:$0xff] }
  0x2d   :  { %288 = vmatprep.subr.mxu0 %v427_v0  ;;  %299 = vmatprep.subr.mxu1 %v427_v0  ;;  %v259_v27 = vld [vmem:[%s504_s4] ss:$0 sm:$0xff]  ;;  %p404_p5 = pnand %p403_p4, %p397_p1 }
  0x2e   :  { %289 = vmatpush3.msra.mxu0 %v61_v7  ;;  %300 = vmatpush3.msra.mxu1 %v159_v9 }
  0x2f   :  { %291 = vmatmul.mubr.msk.f32.vlgmr.msra.gmra.mxu0 %vm72_vm1, %v60_v8  ;;  %301 = vmatprep.subr.mxu1 %v427_v0 }
  0x30   :  { %302 = vmatpush3.msra.mxu1 %v158_v10 }
  0x31   :  { %303 = vmatprep.subr.mxu1 %v427_v0 }
  0x32   :  { %304 = vmatpush3.msra.mxu1 %v157_v11 }
  0x33   :  { %305 = vmatprep.subr.mxu1 %v427_v0 }
  0x34   :  { %306 = vmatpush3.msra.mxu1 %v156_v12 }
  0x35   :  { %307 = vmatprep.subr.mxu1 %v427_v0 }
  0x36   :  { %308 = vmatpush3.msra.mxu1 %v155_v13 }
  0x37   :  { %309 = vmatprep.subr.mxu1 %v427_v0 }
  0x38   :  { %310 = vmatpush3.msra.mxu1 %v154_v14 }
  0x39   :  { %311 = vmatprep.subr.mxu1 %v427_v0 }
  0x3a   :  { %312 = vmatpush3.msra.mxu1 %v153_v15 }
  0x3b   :  { %313 = vmatprep.subr.mxu1 %v427_v0 }
  0x3c   :  { %314 = vmatpush3.msra.mxu1 %v152_v16 }
  0x3d   :  { %315 = vmatprep.subr.mxu1 %v427_v0 }
  0x3e   :  { %316 = vmatpush3.msra.mxu1 %v151_v17 }
  0x3f   :  { %317 = vmatprep.subr.mxu1 %v427_v0 }
  0x40   :  { %318 = vmatpush3.msra.mxu1 %v150_v18 }
  0x41   :  { %319 = vmatprep.subr.mxu1 %v427_v0 }
  0x42   :  { %320 = vmatpush3.msra.mxu1 %v149_v19 }
  0x43   :  { %321 = vmatprep.subr.mxu1 %v427_v0 }
  0x44   :  { %322 = vmatpush3.msra.mxu1 %v148_v20 }
  0x45   :  { %323 = vmatprep.subr.mxu1 %v427_v0 }
  0x46   :  { %324 = vmatpush3.msra.mxu1 %v147_v21 }
  0xef   :  { %v142_v23 = vpop.f32.mrf.mxu0 }
  0xf0   :  { %v143_v24 = vadd.f32 %v257_v22, %v142_v23 }
  0xf1   :  { %v292_v25 = vpop.f32.mrf.mxu0 }
  0xf2   :  { %v146_v26 = vmax.f32 %v143_v24, 0.0 }
  0xf4   :  { %326 = vmatmul.mubr.f32.vlgmr.msra.gmra.mxu1 %v146_v26 }
 0x1b4   :  { %v236_v28 = vpop.f32.mrf.mxu1 }
 0x1b5   :  { %v237_v29 = vadd.f32 %v259_v27, %v236_v28 }
 0x1b6   :  { %v327_v30 = vpop.f32.mrf.mxu1 }
 0x1b7   :  { %240 = vst [vmem:[#allocation8] sm:$0xff] %v237_v29 }
 0x1b8   :  { %407 = shalt.err (!%p404_p5)
}
 0x1b9   :  { %250 = dma.vmem_to_hbm [thread:$0]  %s248_s12, 128, %s505_s5, [#allocation4]  }
 0x1ba   :  { %420 = dma.done.wait [#allocation4], 128  }
 0x1bb   :  { %421 = vsyncadd [#allocation4], 4294967168 }
 0x1bc   :  { %254 = vsyncpa [#allocation3], 1 }
 0x1bd   :  { %255 = vsyncpa [#allocation6], 1 }
 0x1be   :  { %256 = vsyncpa [#allocation4], 1 }

</bundles_post_ra>
